<compile_context>
chip_gen: v7x
topology: tpu7x:2x2x1
jax: 0.10.0
libtpu: 0.0.40
codegen_flags: <defaults>
</compile_context>

<pallas_src>
import jax
import jax.numpy as jnp
from jax.experimental import pallas as pl
from jax.experimental.pallas import tpu as pltpu

DIM = 32                  # dim
REDUCTION = 1
HIDDEN = DIM // REDUCTION
B, H, W = 2, 16, 16
N = H * W                 # tokens per image (256)

# Packed-parameter slab layout (padded to sublane/lane friendly [40, 128]):
#   [0:HIDDEN,   0:2*DIM ]  -> conv1 weight W1  [32, 64]   (x1 half | x2 half)
#   [0:HIDDEN,   2*DIM   ]  -> conv1 bias  b1   [32]
#   [HIDDEN:+2,  0:HIDDEN]  -> conv2 weight W2  [2, 32]
#   [HIDDEN:+2,  HIDDEN  ]  -> conv2 bias  b2   [2]
P_ROWS, P_COLS = 40, 128


# ----------------------------------------------------------------------------
# Fused kernel.
#   x1, x2 : [B, C, N] f32
#   p      : [40, 128] packed parameter slab
#   out    : [2, B*N]  (lane-dense, single unmasked store)
# ----------------------------------------------------------------------------
def spatial_weights_kernel(x1_ref, x2_ref, p_ref, out_ref, xcat_ref):
    # Assemble cat([x1, x2], channel) for BOTH batch elements into one
    # [2C, B*N] = [64, 512] slab: 4 static, tile-aligned VMEM slab copies.
    xcat_ref[0:DIM,       0:N]     = x1_ref[0]
    xcat_ref[0:DIM,       N:2 * N] = x1_ref[1]
    xcat_ref[DIM:2 * DIM, 0:N]     = x2_ref[0]
    xcat_ref[DIM:2 * DIM, N:2 * N] = x2_ref[1]

    # Static slices of the packed parameter slab.
    w1 = p_ref[0:HIDDEN, 0:2 * DIM]                          # [32, 64]
    b1 = p_ref[0:HIDDEN, 2 * DIM:2 * DIM + 1]                # [32, 1]
    w2 = p_ref[HIDDEN:HIDDEN + 2, 0:HIDDEN]                  # [2, 32]
    b2 = p_ref[HIDDEN:HIDDEN + 2, HIDDEN:HIDDEN + 1]         # [2, 1]

    # Conv1 (1x1) + ReLU: ONE MXU dot over the merged batch.
    h = jnp.dot(w1, xcat_ref[...], preferred_element_type=jnp.float32) + b1
    h = jnp.maximum(h, 0.0)                                  # [32, 512]

    # Conv2 (1x1) + Sigmoid: ONE MXU dot, ONE lane-dense [2, 512] store.
    s = jnp.dot(w2, h, preferred_element_type=jnp.float32) + b2
    out_ref[...] = jax.nn.sigmoid(s)


# ----------------------------------------------------------------------------
# Wrapper
# ----------------------------------------------------------------------------
def _full_spec(shape):
    nd = len(shape)
    return pl.BlockSpec(shape, lambda *_: (0,) * nd)


def spatial_weights(x1_nchw, x2_nchw, packed_params):
    # NCHW [B, C, H, W] -> [B, C, N] is a pure (free) reshape, no transpose.
    x1 = x1_nchw.reshape(B, DIM, N)
    x2 = x2_nchw.reshape(B, DIM, N)

    flops = 2 * HIDDEN * (2 * DIM) * (B * N) + 2 * 2 * HIDDEN * (B * N)
    bytes_accessed = (x1.size + x2.size + packed_params.size + 2 * B * N) * 4

    out_flat = pl.pallas_call(
        spatial_weights_kernel,
        out_shape=jax.ShapeDtypeStruct((2, B * N), jnp.float32),
        grid=(1,),
        in_specs=[_full_spec(x1.shape), _full_spec(x2.shape),
                  _full_spec(packed_params.shape)],
        out_specs=_full_spec((2, B * N)),
        scratch_shapes=[pltpu.VMEM((2 * DIM, B * N), jnp.float32)],
        compiler_params=pltpu.CompilerParams(
            dimension_semantics=("arbitrary",)),
        cost_estimate=pl.CostEstimate(
            flops=flops, transcendentals=2 * B * N,
            bytes_accessed=bytes_accessed),
    )(x1, x2, packed_params)

    # [2, B*N] -> [2, B, 1, H, W]: identical index order to PyTorch's
    # mlp(x).reshape(B, 2, 1, H, W).permute(1, 0, 2, 3, 4); pure reshape, free.
    return out_flat.reshape(2, B, 1, H, W)


# Pure-JAX reference (same math, XLA ops) for a correctness check.
def spatial_weights_ref(x1_nchw, x2_nchw, raw_params):
    w1, b1, w2, b2 = raw_params
    x = jnp.concatenate([x1_nchw, x2_nchw], axis=1)           # [B, 2C, H, W]
    h = jnp.einsum('kc,bchw->bkhw', w1, x) + b1.reshape(1, -1, 1, 1)
    h = jnp.maximum(h, 0.0)
    s = jnp.einsum('ok,bkhw->bohw', w2, h) + b2.reshape(1, -1, 1, 1)
    s = jax.nn.sigmoid(s)
    return jnp.transpose(s.reshape(B, 2, 1, H, W), (1, 0, 2, 3, 4))


# ----------------------------------------------------------------------------
# Deterministic parameter construction (Conv2d 1x1 == channel-major matmul)
# and one-time packing of all parameters into a single padded slab.
# ----------------------------------------------------------------------------
def init_params(key):
    C = DIM
    ks = jax.random.split(key, 4)

    def w(k, shape, fan_in):
        return jax.random.normal(k, shape, jnp.float32) / jnp.sqrt(fan_in)

    w1 = w(ks[0], (HIDDEN, 2 * C), 2 * C)       # conv1 weight [out, in]
    b1 = w(ks[1], (HIDDEN,), 2 * C)             # conv1 bias
    w2 = w(ks[2], (2, HIDDEN), HIDDEN)          # conv2 weight [out, in]
    b2 = w(ks[3], (2,), HIDDEN)                 # conv2 bias
    return w1, b1, w2, b2


def pack_params(w1, b1, w2, b2):
    """Pack all parameters into one padded [40, 128] f32 slab (done once)."""
    p = jnp.zeros((P_ROWS, P_COLS), jnp.float32)
    p = p.at[0:HIDDEN, 0:2 * DIM].set(w1)
    p = p.at[0:HIDDEN, 2 * DIM].set(b1)
    p = p.at[HIDDEN:HIDDEN + 2, 0:HIDDEN].set(w2)
    p = p.at[HIDDEN:HIDDEN + 2, HIDDEN].set(b2)
    return p


if __name__ == "__main__":
    key = jax.random.PRNGKey(0)
    k1, k2, kp = jax.random.split(key, 3)
    x1 = jax.random.normal(k1, (B, DIM, H, W), jnp.float32)
    x2 = jax.random.normal(k2, (B, DIM, H, W), jnp.float32)
    raw_params = init_params(kp)
    packed = pack_params(*raw_params)           # one-time, outside the jit

    out = jax.jit(spatial_weights)(x1, x2, packed)
    out = jax.block_until_ready(out)

    ref = jax.jit(spatial_weights_ref)(x1, x2, raw_params)
    ref = jax.block_until_ready(ref)

    assert out.shape == (2, B, 1, H, W)
    assert bool(jnp.all(jnp.isfinite(out)))
    assert bool(jnp.allclose(out, ref, rtol=1e-3, atol=1e-3))
    print("KERNEL_OK")
</pallas_src>

<mosaic_0001>
module attributes {stable_mosaic.version = 11 : i64} {
  func.func @spatial_weights_kernel(%arg0: i32, %arg1: memref<2x32x256xf32, #tpu.memory_space<vmem>>, %arg2: memref<2x32x256xf32, #tpu.memory_space<vmem>>, %arg3: memref<40x128xf32, #tpu.memory_space<vmem>>, %arg4: memref<2x512xf32, #tpu.memory_space<vmem>>, %arg5: memref<64x512xf32, #tpu.memory_space<vmem>>) attributes {dimension_semantics = [#tpu.dimension_semantics<arbitrary>], iteration_bounds = array<i64: 1>, scalar_prefetch = 0 : i64, scratch_operands = 1 : i64, tpu.core_type = #tpu.core_type<tc>, window_params = [{pipeline_mode = #tpu.pipeline_mode<synchronous>, transform_indices = @transform_0, window_bounds = array<i64: 2, 32, 256>}, {pipeline_mode = #tpu.pipeline_mode<synchronous>, transform_indices = @transform_1, window_bounds = array<i64: 2, 32, 256>}, {pipeline_mode = #tpu.pipeline_mode<synchronous>, transform_indices = @transform_2, window_bounds = array<i64: 40, 128>}, {pipeline_mode = #tpu.pipeline_mode<synchronous>, transform_indices = @transform_3, window_bounds = array<i64: 2, 512>}]} {
    %c0 = arith.constant 0 : index
    %c0_0 = arith.constant 0 : index
    %c0_1 = arith.constant 0 : index
    %0 = vector.load %arg1[%c0, %c0_0, %c0_1] : memref<2x32x256xf32, #tpu.memory_space<vmem>>, vector<1x32x256xf32>
    %1 = vector.shape_cast %0 : vector<1x32x256xf32> to vector<32x256xf32>
    %c0_2 = arith.constant 0 : index
    %c0_3 = arith.constant 0 : index
    %2 = vector.load %arg5[%c0_2, %c0_3] : memref<64x512xf32, #tpu.memory_space<vmem>>, vector<32x256xf32>
    tpu.vector_store %arg5[%c0_2, %c0_3], %1 {strides = array<i32>} : memref<64x512xf32, #tpu.memory_space<vmem>>, vector<32x256xf32>,
    %c1 = arith.constant 1 : index
    %c0_4 = arith.constant 0 : index
    %c0_5 = arith.constant 0 : index
    %3 = vector.load %arg1[%c1, %c0_4, %c0_5] : memref<2x32x256xf32, #tpu.memory_space<vmem>>, vector<1x32x256xf32>
    %4 = vector.shape_cast %3 : vector<1x32x256xf32> to vector<32x256xf32>
    %c0_6 = arith.constant 0 : index
    %c256 = arith.constant 256 : index
    %5 = vector.load %arg5[%c0_6, %c256] : memref<64x512xf32, #tpu.memory_space<vmem>>, vector<32x256xf32>
    tpu.vector_store %arg5[%c0_6, %c256], %4 {strides = array<i32>} : memref<64x512xf32, #tpu.memory_space<vmem>>, vector<32x256xf32>,
    %c0_7 = arith.constant 0 : index
    %c0_8 = arith.constant 0 : index
    %c0_9 = arith.constant 0 : index
    %6 = vector.load %arg2[%c0_7, %c0_8, %c0_9] : memref<2x32x256xf32, #tpu.memory_space<vmem>>, vector<1x32x256xf32>
    %7 = vector.shape_cast %6 : vector<1x32x256xf32> to vector<32x256xf32>
    %c32 = arith.constant 32 : index
    %c0_10 = arith.constant 0 : index
    %8 = vector.load %arg5[%c32, %c0_10] : memref<64x512xf32, #tpu.memory_space<vmem>>, vector<32x256xf32>
    tpu.vector_store %arg5[%c32, %c0_10], %7 {strides = array<i32>} : memref<64x512xf32, #tpu.memory_space<vmem>>, vector<32x256xf32>,
    %c1_11 = arith.constant 1 : index
    %c0_12 = arith.constant 0 : index
    %c0_13 = arith.constant 0 : index
    %9 = vector.load %arg2[%c1_11, %c0_12, %c0_13] : memref<2x32x256xf32, #tpu.memory_space<vmem>>, vector<1x32x256xf32>
    %10 = vector.shape_cast %9 : vector<1x32x256xf32> to vector<32x256xf32>
    %c32_14 = arith.constant 32 : index
    %c256_15 = arith.constant 256 : index
    %11 = vector.load %arg5[%c32_14, %c256_15] : memref<64x512xf32, #tpu.memory_space<vmem>>, vector<32x256xf32>
    tpu.vector_store %arg5[%c32_14, %c256_15], %10 {strides = array<i32>} : memref<64x512xf32, #tpu.memory_space<vmem>>, vector<32x256xf32>,
    %c0_16 = arith.constant 0 : index
    %c0_17 = arith.constant 0 : index
    %12 = vector.load %arg3[%c0_16, %c0_17] : memref<40x128xf32, #tpu.memory_space<vmem>>, vector<32x64xf32>
    %c0_18 = arith.constant 0 : index
    %c64 = arith.constant 64 : index
    %13 = vector.load %arg3[%c0_18, %c64] : memref<40x128xf32, #tpu.memory_space<vmem>>, vector<32x1xf32>
    %c32_19 = arith.constant 32 : index
    %c0_20 = arith.constant 0 : index
    %14 = vector.load %arg3[%c32_19, %c0_20] : memref<40x128xf32, #tpu.memory_space<vmem>>, vector<2x32xf32>
    %c32_21 = arith.constant 32 : index
    %c32_22 = arith.constant 32 : index
    %15 = vector.load %arg3[%c32_21, %c32_22] : memref<40x128xf32, #tpu.memory_space<vmem>>, vector<2x1xf32>
    %c0_23 = arith.constant 0 : index
    %c0_24 = arith.constant 0 : index
    %16 = vector.load %arg5[%c0_23, %c0_24] : memref<64x512xf32, #tpu.memory_space<vmem>>, vector<64x512xf32>
    %cst = arith.constant dense<0.000000e+00> : vector<32x512xf32>
    %17 = tpu.matmul %12, %16, %cst {dimension_numbers = #tpu.dot_dimension_numbers<[1], [0], [0], [1], [0, 0, 1, 1], [], []>} : vector<32x64xf32>, vector<64x512xf32>, vector<32x512xf32> -> vector<32x512xf32>
    %18 = vector.broadcast %13 : vector<32x1xf32> to vector<32x512xf32>
    %19 = arith.addf %17, %18 : vector<32x512xf32>
    %cst_25 = arith.constant 0.000000e+00 : f32
    %20 = vector.broadcast %cst_25 : f32 to vector<32x512xf32>
    %21 = arith.maximumf %19, %20 : vector<32x512xf32>
    %cst_26 = arith.constant dense<0.000000e+00> : vector<2x512xf32>
    %22 = tpu.matmul %14, %21, %cst_26 {dimension_numbers = #tpu.dot_dimension_numbers<[1], [0], [0], [1], [0, 0, 1, 1], [], []>} : vector<2x32xf32>, vector<32x512xf32>, vector<2x512xf32> -> vector<2x512xf32>
    %23 = vector.broadcast %15 : vector<2x1xf32> to vector<2x512xf32>
    %24 = arith.addf %22, %23 : vector<2x512xf32>
    %25 = arith.negf %24 : vector<2x512xf32>
    %26 = math.exp %25 : vector<2x512xf32>
    %cst_27 = arith.constant 1.000000e+00 : f32
    %27 = vector.broadcast %cst_27 : f32 to vector<2x512xf32>
    %28 = arith.addf %27, %26 : vector<2x512xf32>
    %29 = arith.divf %27, %28 : vector<2x512xf32>
    %c0_28 = arith.constant 0 : index
    %c0_29 = arith.constant 0 : index
    %30 = vector.load %arg4[%c0_28, %c0_29] : memref<2x512xf32, #tpu.memory_space<vmem>>, vector<2x512xf32>
    tpu.vector_store %arg4[%c0_28, %c0_29], %29 {strides = array<i32>} : memref<2x512xf32, #tpu.memory_space<vmem>>, vector<2x512xf32>,
    return
  }
  func.func @transform_0(%arg0: i32) -> (i32, i32, i32) {
    %c0_i32 = arith.constant 0 : i32
    %c0_i32_0 = arith.constant 0 : i32
    %c0_i32_1 = arith.constant 0 : i32
    %c0_i32_2 = arith.constant 0 : i32
    return %c0_i32, %c0_i32_0, %c0_i32_1 : i32, i32, i32
  }
  func.func @transform_1(%arg0: i32) -> (i32, i32, i32) {
    %c0_i32 = arith.constant 0 : i32
    %c0_i32_0 = arith.constant 0 : i32
    %c0_i32_1 = arith.constant 0 : i32
    %c0_i32_2 = arith.constant 0 : i32
    return %c0_i32, %c0_i32_0, %c0_i32_1 : i32, i32, i32
  }
  func.func @transform_2(%arg0: i32) -> (i32, i32) {
    %c0_i32 = arith.constant 0 : i32
    %c0_i32_0 = arith.constant 0 : i32
    %c0_i32_1 = arith.constant 0 : i32
    return %c0_i32, %c0_i32_0 : i32, i32
  }
  func.func @transform_3(%arg0: i32) -> (i32, i32) {
    %c0_i32 = arith.constant 0 : i32
    %c0_i32_0 = arith.constant 0 : i32
    %c0_i32_1 = arith.constant 0 : i32
    return %c0_i32, %c0_i32_0 : i32, i32
  }
}

</mosaic_0001>

<bundles_post_ra>
// kernel: spatial_weights.1
= control target key start
LH: loop header
LB: loop body
LE: loop exit
PB: predicated region body
PF: predicated region fallthrough
CT: control target
= control target key end

     0   :  { %v642_v3 = vmov 0.0   ;;  %v643_v8 = vmov 64   ;;  %vm137_vm0 = vcmask 523264   ;;  %v644_v55 = vmov 32   ;;  %s803_s0 = inlined_call_operand.vmem [shape: f32[2,32,256], index: 0, kind: input, shape index: {}]   ;;  %s804_s1 = inlined_call_operand.vmem [shape: f32[2,32,256], index: 1, kind: input, shape index: {}]   ;;  %s805_s2 = inlined_call_operand.vmem [shape: f32[40,128], index: 2, kind: input, shape index: {}]   ;;  %s806_s3 = inlined_call_operand.vmem [shape: f32[2,512], index: 3, kind: output, shape index: {}]  }
   0x1   :  { %v15_v0 = vld [vmem:[%s803_s0 + $0x8] sm:$0xff]  ;;  %v17_v1 = vld [vmem:[%s803_s0 + $0x18] sm:$0xff]  ;;  %210 = vmatprep.mubr.f32.mxu0 %v642_v3  ;;  %299 = vmatprep.mubr.f32.mxu1 %v642_v3  ;;  %v14_v6 = vld [vmem:[%s803_s0] sm:$0xff]  ;;  %vm345_vm1 = vcmask 261120  }
   0x2   :  { %v542_v2 = vld [vmem:[%s803_s0 + $0x48] sm:$0xff]  ;;  %v571_v4 = vpack.c.bf16 %v17_v1, %v15_v0  ;;  %v544_v5 = vld [vmem:[%s803_s0 + $0x58] sm:$0xff]  ;;  %v16_v7 = vld [vmem:[%s803_s0 + $0x10] sm:$0xff]  ;;  %623 = vset.pattern.permute.xlu0 %v643_v8  ;;  %624 = vset.pattern.permute.xlu1 %v643_v8 }
   0x3   :  { %v587_v9 = vpack.c.bf16 %v544_v5, %v542_v2  ;;  %v573_v10 = vpack.c.bf16 %v16_v7, %v14_v6  ;;  %v541_v11 = vld [vmem:[%s803_s0 + $0x40] sm:$0xff]  ;;  %v543_v12 = vld [vmem:[%s803_s0 + $0x50] sm:$0xff]  ;;  %v19_v13 = vld [vmem:[%s803_s0 + $0x28] sm:$0xff] }
   0x4   :  { %572 = vmatprep.subr.bf16.mxu0 %v571_v4  ;;  %v589_v14 = vpack.c.bf16 %v543_v12, %v541_v11  ;;  %v21_v15 = vld [vmem:[%s803_s0 + $0x38] sm:$0xff]  ;;  %v546_v16 = vld [vmem:[%s803_s0 + $0x68] sm:$0xff]  ;;  %v18_v20 = vld [vmem:[%s803_s0 + $0x20] sm:$0xff] }
   0x5   :  { %v548_v17 = vld [vmem:[%s803_s0 + $0x78] sm:$0xff]  ;;  %588 = vmatprep.subr.bf16.mxu1 %v587_v9  ;;  %574 = vmatpush1.bf16.msra.mxu0 %v573_v10  ;;  %v575_v18 = vpack.c.bf16 %v21_v15, %v19_v13  ;;  %v20_v21 = vld [vmem:[%s803_s0 + $0x30] sm:$0xff]  ;;  %v545_v22 = vld [vmem:[%s803_s0 + $0x60] sm:$0xff] }
   0x6   :  { %v591_v19 = vpack.c.bf16 %v548_v17, %v546_v16  ;;  %590 = vmatpush1.bf16.msra.mxu1 %v589_v14  ;;  %v577_v23 = vpack.c.bf16 %v20_v21, %v18_v20  ;;  %v547_v24 = vld [vmem:[%s803_s0 + $0x70] sm:$0xff]  ;;  %v48_v25 = vld [vmem:[%s804_s1 + $0x8] sm:$0xff]  ;;  %v50_v26 = vld [vmem:[%s804_s1 + $0x18] sm:$0xff] }
   0x7   :  { %576 = vmatprep.subr.bf16.mxu0 %v575_v18  ;;  %v593_v27 = vpack.c.bf16 %v547_v24, %v545_v22  ;;  %v579_v28 = vpack.c.bf16 %v50_v26, %v48_v25  ;;  %v550_v29 = vld [vmem:[%s804_s1 + $0x48] sm:$0xff]  ;;  %v552_v30 = vld [vmem:[%s804_s1 + $0x58] sm:$0xff]  ;;  %v47_v31 = vld [vmem:[%s804_s1] sm:$0xff] }
   0x8   :  { %592 = vmatprep.subr.bf16.mxu1 %v591_v19  ;;  %v595_v32 = vpack.c.bf16 %v552_v30, %v550_v29  ;;  %v49_v33 = vld [vmem:[%s804_s1 + $0x10] sm:$0xff]  ;;  %v549_v34 = vld [vmem:[%s804_s1 + $0x40] sm:$0xff]  ;;  %v52_v37 = vld [vmem:[%s804_s1 + $0x28] sm:$0xff] }
   0x9   :  { %v551_v35 = vld [vmem:[%s804_s1 + $0x50] sm:$0xff]  ;;  %578 = vmatpush1.bf16.msra.mxu0 %v577_v23  ;;  %v581_v36 = vpack.c.bf16 %v49_v33, %v47_v31  ;;  %v54_v38 = vld [vmem:[%s804_s1 + $0x38] sm:$0xff]  ;;  %v554_v39 = vld [vmem:[%s804_s1 + $0x68] sm:$0xff] }
   0xa   :  { %594 = vmatpush1.bf16.msra.mxu1 %v593_v27  ;;  %580 = vmatprep.subr.bf16.mxu0 %v579_v28  ;;  %v597_v40 = vpack.c.bf16 %v551_v35, %v549_v34  ;;  %v583_v41 = vpack.c.bf16 %v54_v38, %v52_v37  ;;  %v556_v42 = vld [vmem:[%s804_s1 + $0x78] sm:$0xff]  ;;  %v51_v43 = vld [vmem:[%s804_s1 + $0x20] sm:$0xff]  ;;  %v53_v44 = vld [vmem:[%s804_s1 + $0x30] sm:$0xff] }
   0xb   :  { %596 = vmatprep.subr.bf16.mxu1 %v595_v32  ;;  %v599_v45 = vpack.c.bf16 %v556_v42, %v554_v39  ;;  %v553_v46 = vld [vmem:[%s804_s1 + $0x60] sm:$0xff]  ;;  %v555_v47 = vld [vmem:[%s804_s1 + $0x70] sm:$0xff]  ;;  %v585_v50 = vpack.c.bf16 %v53_v44, %v51_v43  ;;  %v81_v52 = vld [vmem:[%s805_s2 + $0x8] sm:$0xff] }
   0xc   :  { %v80_v48 = vld [vmem:[%s805_s2] sm:$0xff]  ;;  %v82_v49 = vld [vmem:[%s805_s2 + $0x10] sm:$0xff]  ;;  %v601_v51 = vpack.c.bf16 %v555_v47, %v553_v46  ;;  %v83_v53 = vld [vmem:[%s805_s2 + $0x18] sm:$0xff] }
   0xd   :  { %119 = vperm.xlu0 %623, %v80_v48   ;;  %582 = vmatpush1.bf16.msra.mxu0 %v581_v36  ;;  %v795_v54 = vld [vmem:[%s805_s2 + $0x20] sm:$0x3] }
   0xe   :  { %129 = vperm.xlu1 %624, %v82_v49   ;;  %598 = vmatpush1.bf16.msra.mxu1 %v597_v40 }
   0xf   :  { %584 = vmatprep.subr.bf16.mxu0 %v583_v41  ;;  %600 = vmatprep.subr.bf16.mxu1 %v599_v45 }
  0x11   :  { %124 = vperm.xlu0 %623, %v81_v52   ;;  %586 = vmatpush1.bf16.msra.mxu0 %v585_v50 }
  0x12   :  { %134 = vperm.xlu1 %624, %v83_v53   ;;  %602 = vmatpush1.bf16.msra.mxu1 %v601_v51 }
  0x14   :  { %557 = vmatmul.mubr.msk.f32.vlgmr.msra.gmra.mrb[0].mxu0 %vm137_vm0, %v80_v48 }
  0x15   :  { %561 = vmatmul.mubr.msk.f32.vlgmr.msra.gmra.mrb[0].mxu1 %vm137_vm0, %v80_v48  ;;  %216 = vmatprep.mubr.f32.mxu0 %v642_v3 }
  0x16   :  { %305 = vmatprep.mubr.f32.mxu1 %v642_v3  ;;  %625 = vset.pattern.permute.xlu0 %v644_v55 }
  0x17   :  { %342 = vperm.xlu0 %625, %v795_v54  }
  0x18   :  { %558 = vmatmul.mubr.msk.f32.gmra.mrb[2].mxu0 %vm137_vm0, %v81_v52 }
  0x19   :  { %562 = vmatmul.mubr.msk.f32.gmra.mrb[2].mxu1 %vm137_vm0, %v81_v52  ;;  %222 = vmatprep.mubr.f32.mxu0 %v642_v3 }
  0x1a   :  { %311 = vmatprep.mubr.f32.mxu1 %v642_v3 }
  0x1c   :  { %559 = vmatmul.mubr.msk.f32.gmra.mrb[4].mxu0 %vm137_vm0, %v82_v49 }
  0x1d   :  { %563 = vmatmul.mubr.msk.f32.gmra.mrb[4].mxu1 %vm137_vm0, %v82_v49  ;;  %228 = vmatprep.mubr.f32.mxu0 %v642_v3 }
  0x1e   :  { %317 = vmatprep.mubr.f32.mxu1 %v642_v3 }
  0x20   :  { %560 = vmatmul.mubr.msk.f32.gmra.mrb[6].mxu0 %vm137_vm0, %v83_v53 }
  0x21   :  { %564 = vmatmul.mubr.msk.f32.gmra.mrb[6].mxu1 %vm137_vm0, %v83_v53  ;;  %412 = vmatprep.mubr.f32.mxu0 %v642_v3 }
  0x22   :  { %483 = vmatprep.mubr.f32.mxu1 %v642_v3 }
  0x8c   :  { %v120_v56 = vpop.permute.xlu0 %119 }
  0x8d   :  { %v130_v7 = vpop.permute.xlu1 %129 }
  0x90   :  { %v125_v60 = vpop.permute.xlu0 %124 }
  0x91   :  { %v135_v29 = vpop.permute.xlu1 %134 }
  0x96   :  { %v343_v52 = vpop.permute.xlu0 %342 }
  0xe7   :  { %v212_v57 = vpop.f32.mrb[0].mxu0 }
  0xe8   :  { %v301_v58 = vpop.f32.mrb[0].mxu1  ;;  %v214_v59 = vpop.f32.mrb[1].mxu0  ;;  %v213_v62 = vadd.f32 %v212_v57, %v120_v56 }
  0xe9   :  { %v303_v61 = vpop.f32.mrb[1].mxu1  ;;  %v302_v63 = vadd.f32 %v301_v58, %v120_v56  ;;  %v215_v0 = vadd.f32 %v214_v59, %v120_v56 }
  0xea   :  { %v304_v2 = vadd.f32 %v303_v61, %v120_v56  ;;  %v324_v10 = vmax.f32 %v213_v62, 0.0 }
  0xeb   :  { %v218_v1 = vpop.f32.mrb[2].mxu0  ;;  %v326_v13 = vmax.f32 %v302_v63, 0.0  ;;  %v325_v14 = vmax.f32 %v215_v0, 0.0 }
  0xec   :  { %v219_v3 = vadd.f32 %v218_v1, %v125_v60  ;;  %v307_v4 = vpop.f32.mrb[2].mxu1  ;;  %v220_v5 = vpop.f32.mrb[3].mxu0  ;;  %v327_v18 = vmax.f32 %v304_v2, 0.0 }
  0xed   :  { %v308_v6 = vadd.f32 %v307_v4, %v125_v60  ;;  %v221_v8 = vadd.f32 %v220_v5, %v125_v60  ;;  %v309_v9 = vpop.f32.mrb[3].mxu1 }
  0xee   :  { %v328_v11 = vmax.f32 %v219_v3, 0.0  ;;  %v310_v12 = vadd.f32 %v309_v9, %v125_v60  ;;  %v645_v9 = vmov 1983009808  }
  0xef   :  { %v330_v15 = vmax.f32 %v308_v6, 0.0  ;;  %v329_v16 = vmax.f32 %v221_v8, 0.0  ;;  %v224_v17 = vpop.f32.mrb[4].mxu0 }
  0xf0   :  { %v605_v19 = vpack.c.bf16 %v328_v11, %v324_v10  ;;  %v331_v20 = vmax.f32 %v310_v12, 0.0  ;;  %v313_v21 = vpop.f32.mrb[4].mxu1  ;;  %v226_v22 = vpop.f32.mrb[5].mxu0  ;;  %v225_v27 = vadd.f32 %v224_v17, %v130_v7  ;;  %v521_v10 = vunpack.c.l.s4 %v645_v9 }
  0xf1   :  { %v613_v23 = vpack.c.bf16 %v330_v15, %v326_v13  ;;  %v603_v24 = vpack.c.bf16 %v329_v16, %v325_v14  ;;  %v315_v25 = vpop.f32.mrb[5].mxu1  ;;  %v314_v28 = vadd.f32 %v313_v21, %v130_v7  ;;  %v227_v30 = vadd.f32 %v226_v22, %v130_v7 }
  0xf2   :  { %v611_v26 = vpack.c.bf16 %v331_v20, %v327_v18  ;;  %v316_v32 = vadd.f32 %v315_v25, %v130_v7  ;;  %v332_v39 = vmax.f32 %v225_v27, 0.0  ;;  %v523_v11 = vlaneseq }
  0xf3   :  { %v230_v31 = vpop.f32.mrb[6].mxu0  ;;  %604 = vmatprep.subr.bf16.mxu0 %v603_v24  ;;  %v334_v42 = vmax.f32 %v314_v28, 0.0  ;;  %v333_v43 = vmax.f32 %v227_v30, 0.0  ;;  %v522_v12 = vunpack.c.0.s8 %v521_v10 }
  0xf4   :  { %v231_v33 = vadd.f32 %v230_v31, %v135_v29  ;;  %v319_v34 = vpop.f32.mrb[6].mxu1  ;;  %612 = vmatprep.subr.bf16.mxu1 %v611_v26  ;;  %v232_v35 = vpop.f32.mrb[7].mxu0  ;;  %606 = vmatpush1.bf16.msra.mxu0 %v605_v19  ;;  %v335_v46 = vmax.f32 %v316_v32, 0.0  ;;  %v524_v13 = vshrl.u32 %v523_v11, 7 }
  0xf5   :  { %v320_v36 = vadd.f32 %v319_v34, %v135_v29  ;;  %v233_v37 = vadd.f32 %v232_v35, %v135_v29  ;;  %v321_v38 = vpop.f32.mrb[7].mxu1  ;;  %614 = vmatpush1.bf16.msra.mxu1 %v613_v23 }
  0xf6   :  { %v336_v40 = vmax.f32 %v231_v33, 0.0  ;;  %v322_v41 = vadd.f32 %v321_v38, %v135_v29  ;;  %v525_v16 = vsub.s32 %v522_v12, %v524_v13 }
  0xf7   :  { %v338_v44 = vmax.f32 %v320_v36, 0.0  ;;  %v337_v45 = vmax.f32 %v233_v37, 0.0 }
  0xf8   :  { %v609_v47 = vpack.c.bf16 %v336_v40, %v332_v39  ;;  %v339_v48 = vmax.f32 %v322_v41, 0.0 }
  0xf9   :  { %v617_v49 = vpack.c.bf16 %v338_v44, %v334_v42  ;;  %v607_v50 = vpack.c.bf16 %v337_v45, %v333_v43 }
  0xfa   :  { %v615_v51 = vpack.c.bf16 %v339_v48, %v335_v46 }
  0xfb   :  { %608 = vmatprep.subr.bf16.mxu0 %v607_v50 }
  0xfc   :  { %616 = vmatprep.subr.bf16.mxu1 %v615_v51  ;;  %610 = vmatpush1.bf16.msra.mxu0 %v609_v47 }
  0xfd   :  { %618 = vmatpush1.bf16.msra.mxu1 %v617_v49 }
  0xff   :  { %565 = vmatmul.mubr.msk.f32.vlgmr.msra.gmra.mrb[8].mxu0 %vm345_vm1, %v795_v54 }
 0x100   :  { %566 = vmatmul.mubr.msk.f32.vlgmr.msra.gmra.mrb[8].mxu1 %vm345_vm1, %v795_v54 }
 0x1d2   :  { %v414_v53 = vpop.f32.mrb[8].mxu0 }
 0x1d3   :  { %v485_v55 = vpop.f32.mrb[8].mxu1  ;;  %v415_v56 = vadd.f32 %v414_v53, %v343_v52  ;;  %v416_v57 = vpop.f32.mrb[9].mxu0 }
 0x1d4   :  { %v486_v58 = vadd.f32 %v485_v55, %v343_v52  ;;  %v417_v59 = vadd.f32 %v416_v57, %v343_v52  ;;  %v487_v60 = vpop.f32.mrb[9].mxu1 }
 0x1d5   :  { %v567_v61 = vmul.f32 -1.442695, %v415_v56  ;;  %v488_v62 = vadd.f32 %v487_v60, %v343_v52 }
 0x1d6   :  { %v569_v63 = vmul.f32 -1.442695, %v486_v58  ;;  %v568_v0 = vmul.f32 -1.442695, %v417_v59 }
 0x1d7   :  { %626 = vpow2.f32 %v567_v61  ;;  %v570_v1 = vmul.f32 -1.442695, %v488_v62 }
 0x1d8   :  { %628 = vpow2.f32 %v569_v63 }
 0x1d9   :  { %630 = vpow2.f32 %v568_v0 }
 0x1da   :  { %632 = vpow2.f32 %v570_v1 }
 0x1e1   :  { %v627_v2 = vpop.eup %626 }
 0x1e2   :  { %v629_v3 = vpop.eup %628  ;;  %v502_v54 = vadd.f32 1.0, %v627_v2 }
 0x1e3   :  { %v631_v4 = vpop.eup %630  ;;  %v504_v5 = vadd.f32 1.0, %v629_v3 }
 0x1e4   :  { %v633_v6 = vpop.eup %632  ;;  %634 = vrcp.f32 %v502_v54  ;;  %v503_v7 = vadd.f32 1.0, %v631_v4 }
 0x1e5   :  { %636 = vrcp.f32 %v504_v5  ;;  %v505_v8 = vadd.f32 1.0, %v633_v6 }
 0x1e6   :  { %638 = vrcp.f32 %v503_v7 }
 0x1e7   :  { %640 = vrcp.f32 %v505_v8 }
 0x1ee   :  { %v635_v14 = vpop.eup %634 }
 0x1ef   :  { %v637_v15 = vpop.eup %636 }
 0x1f0   :  { %v639_v17 = vpop.eup %638 }
 0x1f1   :  { %v641_v18 = vpop.eup %640  ;;  %v518_v19 = vcombine.low %v635_v14, %v639_v17 }
 0x1f2   :  { %v519_v20 = vcombine.low %v637_v15, %v641_v18 }
 0x1f3   :  { %v526_v21 = vrot.slane %v518_v19, %v525_v16 }
 0x1f4   :  { %v533_v22 = vrot.slane %v519_v20, %v525_v16 }
 0x1f6   :  { %v534_v23 = vcombine.low %v526_v21, %v533_v22 }
 0x1f8   :  { %536 = vst [vmem:[%s806_s3] sm:$0xff] %v534_v23 }

</bundles_post_ra>
